<compile_context>
chip_gen: v5e
topology: v5e:2x2
jax: 0.10.0
libtpu: 0.0.40
codegen_flags: <defaults>
</compile_context>

<pallas_src>
import math
import functools

import jax
import jax.numpy as jnp
import numpy as np
from jax.experimental import pallas as pl
from jax.experimental.pallas import tpu as pltpu


def _round_up(x, m):
    return ((x + m - 1) // m) * m


def _pick_tile(dim, pref, align):
    """Largest tile <= pref dividing `dim`; a multiple of `align` unless full-extent."""
    if dim <= pref:
        return dim
    t = (pref // align) * align
    while t >= align:
        if dim % t == 0:
            return t
        t -= align
    return dim  # fallback: single full-extent block (fine for S <= a few K)


@functools.lru_cache(maxsize=1)
def _vmem_limit_bytes():
    """Scoped-VMEM budget: raised above the small defaults, but never the whole
    physical VMEM (v7x has only 64 MiB/core) — leave >=16 MiB compiler headroom."""
    cap = None
    try:
        cap = int(getattr(pltpu.get_tpu_info(), "vmem_capacity_bytes", 0))
    except Exception:
        cap = None
    if not cap:
        return 32 * 1024 * 1024              # safe fallback on any chip
    return max(16 * 1024 * 1024, min(64 * 1024 * 1024, cap - 16 * 1024 * 1024))


# ----------------------------------------------------------------------------
# Tiled linear (x @ w + b) kernel
# ----------------------------------------------------------------------------
def _matmul_bias_kernel(x_ref, w_ref, b_ref, o_ref, acc_ref):
    @pl.when(pl.program_id(2) == 0)
    def _():
        acc_ref[...] = jnp.zeros(acc_ref.shape, jnp.float32)

    # bf16 operands (cast in wrapper), f32 accumulation.
    acc_ref[...] += jnp.dot(x_ref[...], w_ref[...],
                            preferred_element_type=jnp.float32)

    @pl.when(pl.program_id(2) == pl.num_programs(2) - 1)
    def _():
        o_ref[...] = (acc_ref[...] + b_ref[...]).astype(o_ref.dtype)


def _pallas_linear(x2d, w, b, *, out_dtype, tm_pref=512, tn_pref=512, tk_pref=512):
    """x2d: [M, K] @ w: [K, N] + b: [N] -> [M, N] in out_dtype.

    Dimensions that don't divide the chosen tiles are zero-padded (zeros don't
    change the result; padded rows/cols are sliced off), so tiles stay bounded.
    """
    M, K = x2d.shape
    N = w.shape[1]
    tm = tm_pref if M >= tm_pref else _round_up(M, 16)   # >=16 for bf16 sublane pairs
    tn = tn_pref if N >= tn_pref else _round_up(N, 128)
    tk = tk_pref if K >= tk_pref else _round_up(K, 128)
    Mp, Np, Kp = _round_up(M, tm), _round_up(N, tn), _round_up(K, tk)

    if (Mp, Kp) != (M, K):
        x2d = jnp.pad(x2d, ((0, Mp - M), (0, Kp - K)))
    if (Kp, Np) != (K, N):
        w = jnp.pad(w, ((0, Kp - K), (0, Np - N)))
    if Np != N:
        b = jnp.pad(b, (0, Np - N))
    b2d = b.reshape(1, Np).astype(jnp.float32)

    out = pl.pallas_call(
        _matmul_bias_kernel,
        out_shape=jax.ShapeDtypeStruct((Mp, Np), out_dtype),
        grid=(Mp // tm, Np // tn, Kp // tk),
        in_specs=[
            pl.BlockSpec((tm, tk), lambda i, j, k: (i, k)),
            pl.BlockSpec((tk, tn), lambda i, j, k: (k, j)),
            pl.BlockSpec((1, tn), lambda i, j, k: (0, j)),
        ],
        out_specs=pl.BlockSpec((tm, tn), lambda i, j, k: (i, j)),
        scratch_shapes=[pltpu.VMEM((tm, tn), jnp.float32)],
        compiler_params=pltpu.CompilerParams(
            dimension_semantics=("parallel", "parallel", "arbitrary"),
            vmem_limit_bytes=_vmem_limit_bytes()),
    )(x2d, w, b2d)

    if (Mp, Np) != (M, N):
        out = out[:M, :N]
    return out


# ----------------------------------------------------------------------------
# Flash-style attention kernel (online softmax, causal tile skipping,
# key-only additive mask)
# ----------------------------------------------------------------------------
def _flash_attn_kernel(q_ref, k_ref, v_ref, mask_ref, o_ref,
                       m_ref, l_ref, acc_ref, *, exp_dtype):
    ki = pl.program_id(3)
    tq = q_ref.shape[0]
    tk = k_ref.shape[0]
    q0 = pl.program_id(2) * tq
    k0 = ki * tk

    @pl.when(ki == 0)
    def _():
        m_ref[...] = jnp.full(m_ref.shape, -jnp.inf, jnp.float32)
        l_ref[...] = jnp.zeros(l_ref.shape, jnp.float32)
        acc_ref[...] = jnp.zeros(acc_ref.shape, jnp.float32)

    # Skip tiles that are entirely above the causal diagonal (fully masked).
    # The K/V/mask index_maps are clamped so these steps also issue no new DMA.
    @pl.when(k0 < q0 + tq)
    def _():
        q = q_ref[...]                       # [Tq, D], pre-scaled by 1/sqrt(D)
        k = k_ref[...]                       # [Tk, D]
        s = jax.lax.dot_general(q, k, (((1,), (1,)), ((), ())),
                                preferred_element_type=jnp.float32)   # [Tq, Tk]
        mask_row = mask_ref[...]             # [1, Tk] additive key-only mask

        def online_update(scores):
            m_prev = m_ref[...]
            m_new = jnp.maximum(m_prev, jnp.max(scores, axis=-1, keepdims=True))
            alpha = jnp.exp(m_prev - m_new)
            # exp in bf16 on the bf16 path (single EUP slot is the hot unit at
            # small D); m/l/alpha stay f32.
            p = jnp.exp((scores - m_new).astype(exp_dtype))
            l_ref[...] = alpha * l_ref[...] + jnp.sum(
                p.astype(jnp.float32), axis=-1, keepdims=True)
            acc_ref[...] = alpha * acc_ref[...] + jnp.dot(
                p.astype(v_ref.dtype), v_ref[...],
                preferred_element_type=jnp.float32)
            m_ref[...] = m_new

        # Only tiles intersecting the diagonal need the causal iota/where.
        on_band = (k0 + tk) > (q0 + 1)

        @pl.when(on_band)
        def _():
            rows = q0 + jax.lax.broadcasted_iota(jnp.int32, (tq, tk), 0)
            cols = k0 + jax.lax.broadcasted_iota(jnp.int32, (tq, tk), 1)
            neg = jnp.finfo(jnp.float32).min
            online_update(jnp.where(rows >= cols, s, neg) + mask_row)

        @pl.when(jnp.logical_not(on_band))
        def _():
            online_update(s + mask_row)

    @pl.when(ki == pl.num_programs(3) - 1)
    def _():
        inv = pl.reciprocal(l_ref[...], approx=True)   # EUP slot, after PV matmul
        o_ref[...] = (acc_ref[...] * inv).astype(o_ref.dtype)


def _pallas_flash_attention(q, k, v, key_mask, *, compute_dtype,
                            tq_pref=512, tk_pref=512):
    """q, k, v: [B, nH, S, D] (q pre-scaled); key_mask: [B, 1, S] additive f32."""
    B, nH, S, D = q.shape
    tq = _pick_tile(S, tq_pref, 8)
    tk = _pick_tile(S, tk_pref, 128)
    grid = (B, nH, S // tq, S // tk)

    def q_index(b, h, qi, ki):
        return (b, h, qi, 0)

    def kv_index(b, h, qi, ki):
        # Clamp to the last K block this q block actually needs so the
        # auto-pipeline doesn't fetch fully-masked (skipped) tiles.
        last = ((qi + 1) * tq - 1) // tk
        return (b, h, jnp.minimum(ki, last), 0)

    def mask_index(b, h, qi, ki):
        last = ((qi + 1) * tq - 1) // tk
        return (b, 0, jnp.minimum(ki, last))

    def out_index(b, h, qi, ki):
        return (b, h, qi, 0)

    exp_dtype = (jnp.bfloat16
                 if jnp.dtype(compute_dtype) == jnp.dtype(jnp.bfloat16)
                 else jnp.float32)
    kernel = functools.partial(_flash_attn_kernel, exp_dtype=exp_dtype)

    # NOTE: only add pipeline_mode=pl.Buffered(3) to the K/V specs if profiling
    #       shows exposed DMA; after the mask rank-reduction and causal skip the
    #       kernel is normally MXU/EUP-bound and deeper buffering just burns VMEM.
    return pl.pallas_call(
        kernel,
        out_shape=jax.ShapeDtypeStruct((B, nH, S, D), compute_dtype),
        grid=grid,
        in_specs=[
            pl.BlockSpec((pl.Squeezed(), pl.Squeezed(), tq, D), q_index),
            pl.BlockSpec((pl.Squeezed(), pl.Squeezed(), tk, D), kv_index),
            pl.BlockSpec((pl.Squeezed(), pl.Squeezed(), tk, D), kv_index),
            pl.BlockSpec((pl.Squeezed(), 1, tk), mask_index),
        ],
        out_specs=pl.BlockSpec((pl.Squeezed(), pl.Squeezed(), tq, D), out_index),
        scratch_shapes=[
            pltpu.VMEM((tq, 1), jnp.float32),   # running max m
            pltpu.VMEM((tq, 1), jnp.float32),   # running sum l
            pltpu.VMEM((tq, D), jnp.float32),   # output accumulator
        ],
        compiler_params=pltpu.CompilerParams(
            dimension_semantics=("parallel", "parallel", "parallel", "arbitrary"),
            vmem_limit_bytes=_vmem_limit_bytes()),
    )(q, k, v, key_mask)


# ----------------------------------------------------------------------------
# Rotary tables + wrapper forward
# ----------------------------------------------------------------------------
def make_rotary_tables(seq_len, rotary_ndims, base=10000.0):
    inv_freq = 1.0 / (base ** (np.arange(0, rotary_ndims, 2, dtype=np.float32)
                               / rotary_ndims))
    t = np.arange(seq_len, dtype=np.float32)
    freqs = np.einsum("i,j->ij", t, inv_freq)             # [S, rot/2]
    emb = np.concatenate([freqs, freqs], axis=-1)         # [S, rot]
    return jnp.asarray(np.cos(emb)), jnp.asarray(np.sin(emb))


def _rotate_half(x):
    half = x.shape[-1] // 2
    return jnp.concatenate([-x[..., half:], x[..., :half]], axis=-1)


def _apply_rotary(q, k, cos, sin, rotary_ndims):
    """Partial rotary embedding on [B, nH, S, D]; fuses with the head-split transpose."""
    q_rot, q_pass = q[..., :rotary_ndims], q[..., rotary_ndims:]
    k_rot, k_pass = k[..., :rotary_ndims], k[..., rotary_ndims:]
    cosb, sinb = cos[None, None], sin[None, None]
    q_emb = q_rot * cosb + _rotate_half(q_rot) * sinb
    k_emb = k_rot * cosb + _rotate_half(k_rot) * sinb
    return (jnp.concatenate([q_emb, q_pass], axis=-1),
            jnp.concatenate([k_emb, k_pass], axis=-1))


def pgt_attention_forward(hidden_states, attention_mask, params, *,
                          n_heads, head_size, rotary_ndims, cos, sin,
                          compute_dtype=jnp.bfloat16):
    """attention_mask: additive key-only mask, [B, 1, 1, S] (standard) or [B, S]."""
    B, S, H = hidden_states.shape
    inv_norm = 1.0 / math.sqrt(head_size)
    cdt = jnp.dtype(compute_dtype)

    # --- QKV projection (tiled Pallas matmul, bf16 MXU operands, bf16 output) ---
    x2d = hidden_states.reshape(B * S, H)
    qkv = _pallas_linear(x2d.astype(cdt),
                         params["w_qkv"].astype(cdt),
                         params["b_qkv"], out_dtype=cdt)   # [B*S, 3H]
    qkv = qkv.reshape(B, S, n_heads, 3 * head_size)

    # --- split heads + rotary + scale fold (fused elementwise in XLA) ---
    q = jnp.transpose(qkv[..., :head_size], (0, 2, 1, 3))
    k = jnp.transpose(qkv[..., head_size:2 * head_size], (0, 2, 1, 3))
    v = jnp.transpose(qkv[..., 2 * head_size:], (0, 2, 1, 3))
    q, k = _apply_rotary(q, k, cos, sin, rotary_ndims)
    q = (q * inv_norm).astype(cdt)      # fold 1/sqrt(head_size) into q
    k = k.astype(cdt)
    v = v.astype(cdt)

    # --- key-only additive mask, streamed to the kernel as [B, 1, S] ---
    key_mask = attention_mask.reshape(B, 1, S).astype(jnp.float32)

    # --- flash attention (Pallas) ---
    attn = _pallas_flash_attention(q, k, v, key_mask, compute_dtype=cdt)

    # --- merge heads + output projection (tiled Pallas matmul) ---
    merged = jnp.transpose(attn, (0, 2, 1, 3)).reshape(B * S, H)
    out = _pallas_linear(merged.astype(cdt),
                         params["w_dense"].astype(cdt),
                         params["b_dense"], out_dtype=cdt)
    return out.reshape(B, S, H)


# ----------------------------------------------------------------------------
# Pure-JAX reference (mirrors the PyTorch forward) for a correctness check
# ----------------------------------------------------------------------------
def reference_forward(hidden_states, attention_mask, params,
                      n_heads, head_size, rotary_ndims, cos, sin):
    B, S, H = hidden_states.shape
    qkv = hidden_states @ params["w_qkv"] + params["b_qkv"]
    qkv = qkv.reshape(B, S, n_heads, 3 * head_size)
    q = jnp.transpose(qkv[..., :head_size], (0, 2, 1, 3))
    k = jnp.transpose(qkv[..., head_size:2 * head_size], (0, 2, 1, 3))
    v = jnp.transpose(qkv[..., 2 * head_size:], (0, 2, 1, 3))

    q, k = _apply_rotary(q, k, cos, sin, rotary_ndims)

    scores = jnp.einsum("bhqd,bhkd->bhqk", q, k) / math.sqrt(head_size)
    causal = jnp.tril(jnp.ones((S, S), dtype=bool))
    scores = jnp.where(causal[None, None], scores, jnp.finfo(jnp.float32).min)
    scores = scores + attention_mask.reshape(B, 1, 1, S)
    w = jax.nn.softmax(scores, axis=-1)
    out = jnp.einsum("bhqk,bhkd->bhqd", w, v)
    out = jnp.transpose(out, (0, 2, 1, 3)).reshape(B, S, H)
    return out @ params["w_dense"] + params["b_dense"]


# ----------------------------------------------------------------------------
if __name__ == "__main__":
    # Small PGTConfig-consistent shapes
    B, S = 2, 8
    hidden_size = 32
    n_heads = 4
    head_size = hidden_size // n_heads          # 8
    rotary_pct = 0.25
    rotary_ndims = int(head_size * rotary_pct)  # 2

    key = jax.random.PRNGKey(0)
    k1, k2, k3, k4, k5, k6 = jax.random.split(key, 6)

    params = {
        "w_qkv": 0.02 * jax.random.normal(k1, (hidden_size, 3 * hidden_size),
                                          dtype=jnp.float32),
        "b_qkv": 0.02 * jax.random.normal(k2, (3 * hidden_size,),
                                          dtype=jnp.float32),
        "w_dense": 0.02 * jax.random.normal(k3, (hidden_size, hidden_size),
                                            dtype=jnp.float32),
        "b_dense": 0.02 * jax.random.normal(k4, (hidden_size,),
                                            dtype=jnp.float32),
    }

    hidden_states = jax.random.normal(k5, (B, S, hidden_size), dtype=jnp.float32)
    # Standard HF-style additive key-only mask [B, 1, 1, S].
    attention_mask = jnp.where(
        jax.random.uniform(k6, (B, 1, 1, S)) > 0.9, -1e9, 0.0
    ).astype(jnp.float32)

    cos, sin = make_rotary_tables(S, rotary_ndims)

    run = functools.partial(pgt_attention_forward,
                            hidden_states, attention_mask, params,
                            n_heads=n_heads, head_size=head_size,
                            rotary_ndims=rotary_ndims, cos=cos, sin=sin)

    # f32 path: validates semantics tightly.
    out_f32 = jax.block_until_ready(run(compute_dtype=jnp.float32))
    # bf16 path (performance-recommended configuration: bf16 MXU operands,
    # bf16 kernel outputs, bf16 exp in the online softmax).
    out_bf16 = jax.block_until_ready(run(compute_dtype=jnp.bfloat16))

    ref = jax.block_until_ready(
        reference_forward(hidden_states, attention_mask, params,
                          n_heads, head_size, rotary_ndims, cos, sin))

    assert out_f32.shape == (B, S, hidden_size)
    assert out_bf16.shape == (B, S, hidden_size)
    np.testing.assert_allclose(np.asarray(out_f32), np.asarray(ref),
                               rtol=2e-3, atol=2e-3)
    np.testing.assert_allclose(np.asarray(out_bf16.astype(jnp.float32)),
                               np.asarray(ref), rtol=3e-2, atol=3e-2)
    print("KERNEL_OK")
</pallas_src>

<mosaic_0001>
module attributes {stable_mosaic.version = 11 : i64} {
  func.func @_matmul_bias_kernel(%arg0: i32, %arg1: i32, %arg2: i32, %arg3: memref<16x128xf32, #tpu.memory_space<vmem>>, %arg4: memref<128x128xf32, #tpu.memory_space<vmem>>, %arg5: memref<1x128xf32, #tpu.memory_space<vmem>>, %arg6: memref<16x128xf32, #tpu.memory_space<vmem>>, %arg7: memref<16x128xf32, #tpu.memory_space<vmem>>) attributes {dimension_semantics = [#tpu.dimension_semantics<parallel>, #tpu.dimension_semantics<parallel>, #tpu.dimension_semantics<arbitrary>], iteration_bounds = array<i64: 1, 1, 1>, scalar_prefetch = 0 : i64, scratch_operands = 1 : i64, tpu.core_type = #tpu.core_type<tc>, window_params = [{transform_indices = @transform_0, window_bounds = array<i64: 16, 128>}, {transform_indices = @transform_1, window_bounds = array<i64: 128, 128>}, {transform_indices = @transform_2, window_bounds = array<i64: 1, 128>}, {transform_indices = @transform_3, window_bounds = array<i64: 16, 128>}]} {
    %c0_i32 = arith.constant 0 : i32
    %0 = arith.cmpi eq, %arg2, %c0_i32 : i32
    %1 = arith.extui %0 : i1 to i32
    %c0_i32_0 = arith.constant 0 : i32
    %2 = arith.cmpi ne, %1, %c0_i32_0 : i32
    scf.if %2 {
      %cst_10 = arith.constant 0.000000e+00 : f32
      %12 = vector.broadcast %cst_10 : f32 to vector<16x128xf32>
      %c0_11 = arith.constant 0 : index
      %c0_12 = arith.constant 0 : index
      %13 = vector.load %arg7[%c0_11, %c0_12] : memref<16x128xf32, #tpu.memory_space<vmem>>, vector<16x128xf32>
      tpu.vector_store %arg7[%c0_11, %c0_12], %12 {strides = array<i32>} : memref<16x128xf32, #tpu.memory_space<vmem>>, vector<16x128xf32>,
    } else {
    }
    %c0 = arith.constant 0 : index
    %c0_1 = arith.constant 0 : index
    %3 = vector.load %arg7[%c0, %c0_1] : memref<16x128xf32, #tpu.memory_space<vmem>>, vector<16x128xf32>
    %c0_2 = arith.constant 0 : index
    %c0_3 = arith.constant 0 : index
    %4 = vector.load %arg3[%c0_2, %c0_3] : memref<16x128xf32, #tpu.memory_space<vmem>>, vector<16x128xf32>
    %c0_4 = arith.constant 0 : index
    %c0_5 = arith.constant 0 : index
    %5 = vector.load %arg4[%c0_4, %c0_5] : memref<128x128xf32, #tpu.memory_space<vmem>>, vector<128x128xf32>
    %cst = arith.constant dense<0.000000e+00> : vector<16x128xf32>
    %6 = tpu.matmul %4, %5, %cst {dimension_numbers = #tpu.dot_dimension_numbers<[1], [0], [0], [1], [0, 0, 1, 1], [], []>} : vector<16x128xf32>, vector<128x128xf32>, vector<16x128xf32> -> vector<16x128xf32>
    %7 = arith.addf %3, %6 : vector<16x128xf32>
    %c0_6 = arith.constant 0 : index
    %c0_7 = arith.constant 0 : index
    %8 = vector.load %arg7[%c0_6, %c0_7] : memref<16x128xf32, #tpu.memory_space<vmem>>, vector<16x128xf32>
    tpu.vector_store %arg7[%c0_6, %c0_7], %7 {strides = array<i32>} : memref<16x128xf32, #tpu.memory_space<vmem>>, vector<16x128xf32>,
    %c0_i32_8 = arith.constant 0 : i32
    %9 = arith.cmpi eq, %arg2, %c0_i32_8 : i32
    %10 = arith.extui %9 : i1 to i32
    %c0_i32_9 = arith.constant 0 : i32
    %11 = arith.cmpi ne, %10, %c0_i32_9 : i32
    scf.if %11 {
      %c0_10 = arith.constant 0 : index
      %c0_11 = arith.constant 0 : index
      %12 = vector.load %arg7[%c0_10, %c0_11] : memref<16x128xf32, #tpu.memory_space<vmem>>, vector<16x128xf32>
      %c0_12 = arith.constant 0 : index
      %c0_13 = arith.constant 0 : index
      %13 = vector.load %arg5[%c0_12, %c0_13] : memref<1x128xf32, #tpu.memory_space<vmem>>, vector<1x128xf32>
      %14 = vector.broadcast %13 : vector<1x128xf32> to vector<16x128xf32>
      %15 = arith.addf %12, %14 : vector<16x128xf32>
      %c0_14 = arith.constant 0 : index
      %c0_15 = arith.constant 0 : index
      %16 = vector.load %arg6[%c0_14, %c0_15] : memref<16x128xf32, #tpu.memory_space<vmem>>, vector<16x128xf32>
      tpu.vector_store %arg6[%c0_14, %c0_15], %15 {strides = array<i32>} : memref<16x128xf32, #tpu.memory_space<vmem>>, vector<16x128xf32>,
    } else {
    }
    return
  }
  func.func @transform_0(%arg0: i32, %arg1: i32, %arg2: i32) -> (i32, i32) {
    %c0_i32 = arith.constant 0 : i32
    return %arg0, %arg2 : i32, i32
  }
  func.func @transform_1(%arg0: i32, %arg1: i32, %arg2: i32) -> (i32, i32) {
    %c0_i32 = arith.constant 0 : i32
    return %arg2, %arg1 : i32, i32
  }
  func.func @transform_2(%arg0: i32, %arg1: i32, %arg2: i32) -> (i32, i32) {
    %c0_i32 = arith.constant 0 : i32
    %c0_i32_0 = arith.constant 0 : i32
    return %c0_i32, %arg1 : i32, i32
  }
  func.func @transform_3(%arg0: i32, %arg1: i32, %arg2: i32) -> (i32, i32) {
    %c0_i32 = arith.constant 0 : i32
    return %arg0, %arg1 : i32, i32
  }
}

</mosaic_0001>

<bundles_post_ra>
// kernel: tpu_custom_call.1
= control target key start
LH: loop header
LB: loop body
LE: loop exit
PB: predicated region body
PF: predicated region fallthrough
CT: control target
= control target key end

     0   :  { %8 = vsyncpa [#allocation4], 0  ;;  %s279_s0 = inlined_call_operand.hbm [shape: f32[16,128], index: 0, kind: input, shape index: {}]   ;;  %s280_s1 = inlined_call_operand.hbm [shape: f32[128,128], index: 1, kind: input, shape index: {}]   ;;  %s281_s2 = inlined_call_operand.vmem [shape: f32[1,128], index: 2, kind: input, shape index: {}]   ;;  %s282_s3 = inlined_call_operand.hbm [shape: f32[16,128], index: 3, kind: output, shape index: {}]  }
   0x1   :  { %9 = vsyncpa [#allocation7], 0 }
   0x2   :  { %10 = vsyncpa [#allocation5], 0  ;;  %s15_s14 = sshll.u32 %s279_s0, 4  ;;  %s233_s15 = smov [#allocation3]   ;;  %s16_s14 = int_to_ptr.hbm [resolvable:$true] %s15_s14 }
   0x3   :  { %s17_s16 = sshll.u32 %s233_s15, 4  ;;  %s28_s19 = sshll.u32 %s280_s1, 4  ;;  %s18_s16 = int_to_ptr.vmem [resolvable:$true] %s17_s16  ;;  %s29_s19 = int_to_ptr.hbm [resolvable:$true] %s28_s19 }
   0x4   :  { %s234_s20 = smov 128   ;;  %s235_s21 = smov 8  }
   0x5   :  { %23 = dma.hbm_to_vmem [thread:$0]  %s16_s14, 256, %s18_s16, [#allocation4], %s234_s20, %s234_s20, %s235_s21  }
   0x6   :  { %s236_s22 = smov [#allocation6]  }
   0x7   :  { %s30_s23 = sshll.u32 %s236_s22, 4  ;;  %s31_s23 = int_to_ptr.vmem [resolvable:$true] %s30_s23 }
   0x8   :  { %36 = dma.hbm_to_vmem [thread:$0]  %s29_s19, 2048, %s31_s23, [#allocation7], %s234_s20, %s234_s20, %s235_s21  }
   0x9   :  { %227 = dma.done.wait [#allocation4], 256  }
   0xa   :  { %228 = vsyncadd [#allocation4], 4294967040 }
   0xb   :  { %229 = dma.done.wait [#allocation7], 2048  }
   0xc   :  { %230 = vsyncadd [#allocation7], 4294965248  ;;  %v72_v0 = vld [vmem:[#allocation6 + $0x78] sm:$0xff]  ;;  %v71_v1 = vld [vmem:[#allocation6 + $0x70] sm:$0xff]  ;;  %s237_s24 = smov [#allocation8]   ;;  %s119_s28 = sshll.u32 %s282_s3, 4  ;;  %s120_s28 = int_to_ptr.hbm [resolvable:$true] %s119_s28 }
   0xd   :  { %73 = vmatpush.msra.mxu0 %v72_v0  ;;  %133 = vmatpush.msra.mxu1 %v72_v0  ;;  %v70_v2 = vld [vmem:[#allocation6 + $0x68] sm:$0xff]  ;;  %v69_v3 = vld [vmem:[#allocation6 + $0x60] sm:$0xff]  ;;  %v68_v4 = vld [vmem:[#allocation6 + $0x58] sm:$0xff]  ;;  %s117_s25 = sshll.u32 %s237_s24, 4  ;;  %s118_s25 = int_to_ptr.vmem [resolvable:$true] %s117_s25 }
   0xe   :  { %v67_v5 = vld [vmem:[#allocation6 + $0x50] sm:$0xff]  ;;  %v66_v6 = vld [vmem:[#allocation6 + $0x48] sm:$0xff]  ;;  %v65_v7 = vld [vmem:[#allocation6 + $0x40] sm:$0xff] }
   0xf   :  { %74 = vmatpush.msra.mxu0 %v71_v1  ;;  %134 = vmatpush.msra.mxu1 %v71_v1  ;;  %v64_v8 = vld [vmem:[#allocation6 + $0x38] sm:$0xff]  ;;  %v63_v9 = vld [vmem:[#allocation6 + $0x30] sm:$0xff]  ;;  %v62_v10 = vld [vmem:[#allocation6 + $0x28] sm:$0xff] }
  0x10   :  { %v61_v11 = vld [vmem:[#allocation6 + $0x20] sm:$0xff]  ;;  %v60_v12 = vld [vmem:[#allocation6 + $0x18] sm:$0xff]  ;;  %v59_v13 = vld [vmem:[#allocation6 + $0x10] sm:$0xff] }
  0x11   :  { %75 = vmatpush.msra.mxu0 %v70_v2  ;;  %135 = vmatpush.msra.mxu1 %v70_v2  ;;  %v58_v14 = vld [vmem:[#allocation6 + $0x8] sm:$0xff]  ;;  %v57_v15 = vld [vmem:[#allocation6] sm:$0xff]  ;;  %v55_v16 = vld [vmem:[#allocation3] sm:$0xff] }
  0x12   :  { %v56_v17 = vld [vmem:[#allocation3 + $0x8] sm:$0xff]  ;;  %v154_v18 = vld [vmem:[%s281_s2] ss:$0 sm:$0xff] }
  0x13   :  { %76 = vmatpush.msra.mxu0 %v69_v3  ;;  %136 = vmatpush.msra.mxu1 %v69_v3 }
  0x15   :  { %77 = vmatpush.msra.mxu0 %v68_v4  ;;  %137 = vmatpush.msra.mxu1 %v68_v4 }
  0x17   :  { %78 = vmatpush.msra.mxu0 %v67_v5  ;;  %138 = vmatpush.msra.mxu1 %v67_v5 }
  0x19   :  { %79 = vmatpush.msra.mxu0 %v66_v6  ;;  %139 = vmatpush.msra.mxu1 %v66_v6 }
  0x1b   :  { %80 = vmatpush.msra.mxu0 %v65_v7  ;;  %140 = vmatpush.msra.mxu1 %v65_v7 }
  0x1d   :  { %81 = vmatpush.msra.mxu0 %v64_v8  ;;  %141 = vmatpush.msra.mxu1 %v64_v8 }
  0x1f   :  { %82 = vmatpush.msra.mxu0 %v63_v9  ;;  %142 = vmatpush.msra.mxu1 %v63_v9 }
  0x21   :  { %83 = vmatpush.msra.mxu0 %v62_v10  ;;  %143 = vmatpush.msra.mxu1 %v62_v10 }
  0x23   :  { %84 = vmatpush.msra.mxu0 %v61_v11  ;;  %144 = vmatpush.msra.mxu1 %v61_v11 }
  0x25   :  { %85 = vmatpush.msra.mxu0 %v60_v12  ;;  %145 = vmatpush.msra.mxu1 %v60_v12 }
  0x27   :  { %86 = vmatpush.msra.mxu0 %v59_v13  ;;  %146 = vmatpush.msra.mxu1 %v59_v13 }
  0x29   :  { %87 = vmatpush.msra.mxu0 %v58_v14  ;;  %147 = vmatpush.msra.mxu1 %v58_v14 }
  0x2b   :  { %88 = vmatpush.msra.mxu0 %v57_v15  ;;  %148 = vmatpush.msra.mxu1 %v57_v15 }
  0x2c   :  { %89 = vmatmul.f32.vlgmr.msra.gmra.mxu0 %v55_v16  ;;  %92 = vmatmul.f32.vlgmr.msra.gmra.mxu1 %v56_v17 }
  0xa9   :  { %v90_v19 = vpop.f32.mrf.mxu0  ;;  %v93_v20 = vpop.f32.mrf.mxu1 }
  0xaa   :  { %v109_v21 = vadd.f32 %v154_v18, %v90_v19  ;;  %v110_v22 = vadd.f32 %v154_v18, %v93_v20 }
  0xac   :  { %111 = vst [vmem:[#allocation8] sm:$0xff] %v109_v21 }
  0xad   :  { %112 = vst [vmem:[#allocation8 + $0x8] sm:$0xff] %v110_v22 }
  0xae   :  { %125 = dma.vmem_to_hbm [thread:$0]  %s118_s25, 256, %s120_s28, [#allocation5], %s234_s20, %s234_s20, %s235_s21  }
  0xaf   :  { %231 = dma.done.wait [#allocation5], 256  }
  0xb0   :  { %232 = vsyncadd [#allocation5], 4294967040 }
  0xb1   :  { %130 = vsyncpa [#allocation4], 1 }
  0xb2   :  { %131 = vsyncpa [#allocation7], 1 }
  0xb3   :  { %132 = vsyncpa [#allocation5], 1 }

</bundles_post_ra>
